<compile_context>
chip_gen: v7x
topology: tpu7x:2x2x1
jax: 0.10.0
libtpu: 0.0.40
codegen_flags: <defaults>
</compile_context>

<pallas_src>
import functools
import math

import jax
import jax.numpy as jnp
from jax import lax
from jax.experimental import pallas as pl
from jax.experimental.pallas import tpu as pltpu


def _round_up(v, m):
    return (v + m - 1) // m * m


def _inv_norm(v, axis=-1):
    # 1 / max(||v||, 1e-12)  (matches F.normalize eps), via rsqrt on the EUP.
    return lax.rsqrt(jnp.maximum(jnp.sum(v * v, axis=axis, keepdims=True), 1e-24))


def svx_softmax_kernel(x_ref, w_ref, side_ref, o_ref, *, s, t):
    # x_ref:    (tm, D)  bf16, rows already L2-normalized AND pre-scaled by s.
    # w_ref:    (D, tn)  bf16, weight^T with rows of W already L2-normalized.
    # side_ref: (tm, 3)  f32  : [ s*thr, s*final_gt, bitcast(label -> f32) ].
    # o_ref:    (tm, tn) out.
    cos_s = jnp.dot(x_ref[...], w_ref[...],
                    preferred_element_type=jnp.float32)      # = s * cos_theta
    cos_s = jnp.clip(cos_s, -s, s)                           # s * clamp(cos, -1, 1)

    tm, tn = cos_s.shape
    side = side_ref[...]
    thr_s = side[:, 0:1]                                     # (tm, 1) s * threshold
    fgt_s = side[:, 1:2]                                     # (tm, 1) s * final_gt
    labels = pltpu.bitcast(side[:, 2:3], jnp.int32)          # (tm, 1) global class id

    # Label column localized to this class tile: removes the full-tile `+ j*tn`.
    local_lab = labels - pl.program_id(0) * tn
    onehot = lax.broadcasted_iota(jnp.int32, (tm, tn), 1) == local_lab

    # MV hard-example reweighting with *s folded into constants:
    #   s * ((t+1)*cos + t) == (t+1)*cos_s + t*s
    hard = cos_s * (t + 1.0) + (t * s)
    out = jnp.where(onehot, fgt_s, jnp.where(cos_s > thr_s, hard, cos_s))
    o_ref[...] = out.astype(o_ref.dtype)


def svx_softmax(x, weight, label, *, xtype="MV-AM", s=32.0, m=0.35, t=0.2,
                easy_margin=False, block_b=256, block_c=2048,
                mxu_dtype=jnp.bfloat16, out_dtype=jnp.float32):
    """x: (B, D), weight: (C, D), label: (B,) int. Returns (B, C) logits * s."""
    B, D = x.shape
    C, D2 = weight.shape
    assert D == D2
    label = label.astype(jnp.int32)
    s, m, t = float(s), float(m), float(t)

    xf = x.astype(jnp.float32)
    wf = weight.astype(jnp.float32)
    inv_x = _inv_norm(xf)                       # (B, 1)
    inv_w = _inv_norm(wf)                       # (C, 1)

    # ---- tiny O(B*D) f32 pre-pass: gt = clamp(cos(x, w[label]), -1, 1) --------
    # (labels assumed in-range; the JAX gather clamps OOB indices silently,
    #  where PyTorch would raise.)
    w_lab = wf[label]                                               # (B, D)
    gt = jnp.sum(xf * w_lab, axis=-1, keepdims=True) * inv_x * inv_w[label]
    gt = jnp.clip(gt, -1.0, 1.0)                                    # (B, 1)

    if xtype == "MV-AM":
        # Mask threshold is always gt - m (matches PyTorch, even with easy_margin).
        thr = gt - m
        fgt = jnp.where(gt > 0, gt - m, gt) if easy_margin else (gt - m)
    elif xtype == "MV-Arc":
        sin_theta = jnp.sqrt(jnp.maximum(1.0 - gt * gt, 0.0))
        cos_theta_m = gt * math.cos(m) - sin_theta * math.sin(m)
        thr = cos_theta_m
        fgt = jnp.where(gt > 0, cos_theta_m, gt) if easy_margin else cos_theta_m
    else:
        raise ValueError("unknown xtype!")

    # ---- hoist normalization / transpose / casts out of the kernel -----------
    # x gets the *s scale folded into the (existing) normalization multiply.
    x_n = (xf * (inv_x * s)).astype(mxu_dtype)                      # (B, D)
    w_t = (wf * inv_w).astype(mxu_dtype).T                          # (D, C) lane-dense

    # Packed per-row side data: [s*thr, s*final_gt, bitcast(label)].
    side = jnp.concatenate(
        [thr * s, fgt * s,
         lax.bitcast_convert_type(label.reshape(B, 1), jnp.float32)],
        axis=1)                                                     # (B, 3) f32

    # ---- tile sizes: lane-dense (tn % 128 == 0), sublane aligned (tm % 8) -----
    tm = min(block_b, _round_up(B, 8))
    tn = min(block_c, _round_up(C, 128))
    Bp = _round_up(B, tm)
    Cp = _round_up(C, tn)

    if Bp != B:
        x_n = jnp.pad(x_n, ((0, Bp - B), (0, 0)))
        side = jnp.pad(side, ((0, Bp - B), (0, 0)))     # padded rows sliced off below
    if Cp != C:
        w_t = jnp.pad(w_t, ((0, 0), (0, Cp - C)))

    kernel = functools.partial(svx_softmax_kernel, s=s, t=t)
    out = pl.pallas_call(
        kernel,
        out_shape=jax.ShapeDtypeStruct((Bp, Cp), out_dtype),
        # Class tiles OUTER (parallel -> megacore shards the weight stream),
        # batch tiles INNER (weight block stays VMEM-resident across the sweep).
        grid=(Cp // tn, Bp // tm),
        in_specs=[
            pl.BlockSpec((tm, D), lambda j, i: (i, 0)),   # x (tiny, re-streamed)
            pl.BlockSpec((D, tn), lambda j, i: (0, j)),   # weight^T (HBM-read once)
            pl.BlockSpec((tm, 3), lambda j, i: (i, 0)),   # packed thr/fgt/label
        ],
        out_specs=pl.BlockSpec((tm, tn), lambda j, i: (i, j)),
        compiler_params=pltpu.CompilerParams(
            dimension_semantics=("parallel", "arbitrary")),
    )(x_n, w_t, side)

    if Bp != B or Cp != C:
        out = out[:B, :C]
    return out


def svx_softmax_reference(x, weight, label, *, s=32.0, m=0.35, t=0.2):
    """Pure-JAX f32 reference mirroring the PyTorch forward (MV-AM, easy_margin=False).
    Returns (out, cos_theta, gt) so the test can exclude mask-boundary entries
    when comparing against the bf16-MXU kernel."""
    x_n = x * _inv_norm(x)
    w_n = weight * _inv_norm(weight)
    cos = jnp.dot(x_n, w_n.T, precision=lax.Precision.HIGHEST)
    cos = jnp.clip(cos, -1.0, 1.0)
    B, C = cos.shape
    gt = cos[jnp.arange(B), label].reshape(-1, 1)
    out = jnp.where(cos > gt - m, (t + 1.0) * cos + t, cos)
    onehot = jax.nn.one_hot(label, C, dtype=bool)
    out = jnp.where(onehot, gt - m, out)
    return out * s, cos, gt


def init_weight(key, out_features, in_features):
    """Deterministic emulation of uniform_(-1,1).renorm_(2, 1, 1e-5).mul_(1e5)."""
    w = jax.random.uniform(key, (out_features, in_features),
                           minval=-1.0, maxval=1.0, dtype=jnp.float32)
    col_norm = jnp.sqrt(jnp.sum(w * w, axis=0, keepdims=True))
    factor = jnp.where(col_norm > 1e-5, 1e-5 / (col_norm + 1e-7), 1.0)
    return w * factor * 1e5


if __name__ == "__main__":
    B, D, C = 16, 64, 1024      # batch, in_features, out_features (classes)
    s, m, t = 32.0, 0.35, 0.2
    key = jax.random.PRNGKey(0)
    kx, kw, kl = jax.random.split(key, 3)

    x = jax.random.normal(kx, (B, D), dtype=jnp.float32)
    weight = init_weight(kw, C, D)
    label = jax.random.randint(kl, (B,), 0, C, dtype=jnp.int32)

    out = jax.block_until_ready(svx_softmax(x, weight, label, s=s, m=m, t=t))
    assert out.shape == (B, C)
    assert bool(jnp.all(jnp.isfinite(out)))

    ref, cos_f32, gt_f32 = svx_softmax_reference(x, weight, label, s=s, m=m, t=t)
    diff = jnp.abs(out - ref)

    # Entries whose MV "hard" mask decision lies inside the bf16 matmul error
    # band may legitimately flip vs the f32 reference; exclude only those.
    near_boundary = jnp.abs(cos_f32 - (gt_f32 - m)) < 0.05
    assert bool(jnp.all(jnp.where(near_boundary, True, diff < 0.5))), \
        "mismatch vs f32 reference away from the mask boundary"

    # The scattered label column (final_gt) must match tightly.
    onehot = jax.nn.one_hot(label, C, dtype=bool)
    assert bool(jnp.all(jnp.where(onehot, diff < 1e-3, True))), \
        "label-column scatter mismatch"

    print("KERNEL_OK")
</pallas_src>

<mosaic_0001>
module attributes {stable_mosaic.version = 11 : i64} {
  func.func @svx_softmax_kernel(%arg0: i32, %arg1: i32, %arg2: memref<16x64xbf16, #tpu.memory_space<vmem>>, %arg3: memref<64x1024xbf16, #tpu.memory_space<vmem>>, %arg4: memref<16x3xf32, #tpu.memory_space<vmem>>, %arg5: memref<16x1024xf32, #tpu.memory_space<vmem>>) attributes {dimension_semantics = [#tpu.dimension_semantics<parallel>, #tpu.dimension_semantics<arbitrary>], iteration_bounds = array<i64: 1, 1>, scalar_prefetch = 0 : i64, scratch_operands = 0 : i64, tpu.core_type = #tpu.core_type<tc>, window_params = [{transform_indices = @transform_0, window_bounds = array<i64: 16, 64>}, {transform_indices = @transform_1, window_bounds = array<i64: 64, 1024>}, {transform_indices = @transform_2, window_bounds = array<i64: 16, 3>}, {transform_indices = @transform_3, window_bounds = array<i64: 16, 1024>}]} {
    %c0 = arith.constant 0 : index
    %c0_0 = arith.constant 0 : index
    %0 = vector.load %arg2[%c0, %c0_0] : memref<16x64xbf16, #tpu.memory_space<vmem>>, vector<16x64xbf16>
    %c0_1 = arith.constant 0 : index
    %c0_2 = arith.constant 0 : index
    %1 = vector.load %arg3[%c0_1, %c0_2] : memref<64x1024xbf16, #tpu.memory_space<vmem>>, vector<64x1024xbf16>
    %cst = arith.constant dense<0.000000e+00> : vector<16x1024xf32>
    %2 = tpu.matmul %0, %1, %cst {dimension_numbers = #tpu.dot_dimension_numbers<[1], [0], [0], [1], [0, 0, 1, 1], [], []>} : vector<16x64xbf16>, vector<64x1024xbf16>, vector<16x1024xf32> -> vector<16x1024xf32>
    %cst_3 = arith.constant -3.200000e+01 : f32
    %cst_4 = arith.constant 3.200000e+01 : f32
    %3 = vector.broadcast %cst_3 : f32 to vector<16x1024xf32>
    %4 = arith.maximumf %3, %2 : vector<16x1024xf32>
    %5 = vector.broadcast %cst_4 : f32 to vector<16x1024xf32>
    %6 = arith.minimumf %5, %4 : vector<16x1024xf32>
    %c0_5 = arith.constant 0 : index
    %c0_6 = arith.constant 0 : index
    %7 = vector.load %arg4[%c0_5, %c0_6] : memref<16x3xf32, #tpu.memory_space<vmem>>, vector<16x3xf32>
    %8 = vector.extract_strided_slice %7 {offsets = [0, 0], sizes = [16, 1], strides = [1, 1]} : vector<16x3xf32> to vector<16x1xf32>
    %9 = vector.extract_strided_slice %7 {offsets = [0, 1], sizes = [16, 1], strides = [1, 1]} : vector<16x3xf32> to vector<16x1xf32>
    %10 = vector.extract_strided_slice %7 {offsets = [0, 2], sizes = [16, 1], strides = [1, 1]} : vector<16x3xf32> to vector<16x1xf32>
    %11 = tpu.bitcast %10 : vector<16x1xf32> -> vector<16x1xi32>
    %c1024_i32 = arith.constant 1024 : i32
    %12 = arith.muli %arg0, %c1024_i32 : i32
    %13 = vector.broadcast %12 : i32 to vector<16x1xi32>
    %14 = arith.subi %11, %13 : vector<16x1xi32>
    %15 = tpu.iota {dimensions = array<i32: 1>} : vector<16x1024xi32>
    %16 = vector.broadcast %14 : vector<16x1xi32> to vector<16x1024xi32>
    %17 = arith.cmpi eq, %15, %16 : vector<16x1024xi32>
    %cst_7 = arith.constant 1.200000e+00 : f32
    %18 = vector.broadcast %cst_7 : f32 to vector<16x1024xf32>
    %19 = arith.mulf %6, %18 : vector<16x1024xf32>
    %cst_8 = arith.constant 6.400000e+00 : f32
    %20 = vector.broadcast %cst_8 : f32 to vector<16x1024xf32>
    %21 = arith.addf %19, %20 : vector<16x1024xf32>
    %22 = vector.broadcast %8 : vector<16x1xf32> to vector<16x1024xf32>
    %23 = arith.cmpf ogt, %6, %22 : vector<16x1024xf32>
    %24 = arith.select %23, %21, %6 : vector<16x1024xi1>, vector<16x1024xf32>
    %25 = vector.shape_cast %9 : vector<16x1xf32> to vector<16x1xf32>
    %26 = vector.broadcast %25 : vector<16x1xf32> to vector<16x1024xf32>
    %27 = arith.select %17, %26, %24 : vector<16x1024xi1>, vector<16x1024xf32>
    %c0_9 = arith.constant 0 : index
    %c0_10 = arith.constant 0 : index
    %28 = vector.load %arg5[%c0_9, %c0_10] : memref<16x1024xf32, #tpu.memory_space<vmem>>, vector<16x1024xf32>
    tpu.vector_store %arg5[%c0_9, %c0_10], %27 {strides = array<i32>} : memref<16x1024xf32, #tpu.memory_space<vmem>>, vector<16x1024xf32>,
    return
  }
  func.func @transform_0(%arg0: i32, %arg1: i32) -> (i32, i32) {
    %c0_i32 = arith.constant 0 : i32
    %c0_i32_0 = arith.constant 0 : i32
    return %arg1, %c0_i32 : i32, i32
  }
  func.func @transform_1(%arg0: i32, %arg1: i32) -> (i32, i32) {
    %c0_i32 = arith.constant 0 : i32
    %c0_i32_0 = arith.constant 0 : i32
    return %c0_i32, %arg0 : i32, i32
  }
  func.func @transform_2(%arg0: i32, %arg1: i32) -> (i32, i32) {
    %c0_i32 = arith.constant 0 : i32
    %c0_i32_0 = arith.constant 0 : i32
    return %arg1, %c0_i32 : i32, i32
  }
  func.func @transform_3(%arg0: i32, %arg1: i32) -> (i32, i32) {
    %c0_i32 = arith.constant 0 : i32
    return %arg1, %arg0 : i32, i32
  }
}

</mosaic_0001>

<bundles_post_ra>
// kernel: tpu_custom_call.1
= control target key start
LH: loop header
LB: loop body
LE: loop exit
PB: predicated region body
PF: predicated region fallthrough
CT: control target
= control target key end

     0   :  { %8 = vsyncpa [#allocation3], 0  ;;  %s936_s0 = inlined_call_operand.vmem [shape: bf16[16,64], index: 0, kind: input, shape index: {}]   ;;  %s937_s1 = inlined_call_operand.hbm [shape: bf16[64,1024], index: 1, kind: input, shape index: {}]   ;;  %s938_s2 = inlined_call_operand.vmem [shape: f32[16,3], index: 2, kind: input, shape index: {}]   ;;  %s939_s3 = inlined_call_operand.hbm [shape: f32[16,1024], index: 3, kind: output, shape index: {}]  }
   0x1   :  { %9 = vsyncpa [#allocation4], 0  ;;  %s720_s12 = smov [#allocation2]   ;;  %s672_s16 = scalar_lea.hbm %s937_s1, 4096 }
   0x2   :  { %s17_s13 = sshll.u32 %s720_s12, 4  ;;  %p673_p0 = scmp.ne.s32.totalorder %s937_s1, %s672_s16  ;;  %s18_s13 = int_to_ptr.vmem [resolvable:$true] %s17_s13 }
   0x3   :  { %p676_p1 = scmp.lt.u32.totalorder %s672_s16, %s937_s1 }
   0x5   :  { %p678_p2 = pnand %p676_p1, %p673_p0 }
   0x7   :  { %681 = shalt.err (!%p678_p2)
}
   0x8   :  { %s682_s21 = scalar_lea.vmem %s18_s13, 4096  ;;  %p687_p4 = scmp.lt.s32.totalorder %s18_s13, %s18_s13 }
   0x9   :  { %p683_p3 = scmp.ne.s32.totalorder %s18_s13, %s682_s21  ;;  %p688_p5 = scmp.lt.s32.totalorder %s682_s21, %s682_s21 }
   0xb   :  { %p689_p6 = por %p688_p5, %p687_p4 }
   0xd   :  { %p690_p7 = pnand %p689_p6, %p683_p3 }
   0xf   :  { %693 = shalt.err (!%p690_p7)
}
  0x10   :  { %s721_s22 = smov 512   ;;  %s722_s23 = smov 32  }
  0x11   :  { %23 = dma.hbm_to_vmem [thread:$0]  %s937_s1, 4096, %s18_s13, [#allocation3], %s721_s22, %s721_s22, %s722_s23  }
  0x12   :  { %716 = dma.done.wait [#allocation3], 4096  }
  0x13   :  { %717 = vsyncadd [#allocation3], 4294963200  ;;  %v723_v0 = vmov 0   ;;  %v724_v1 = vmov 2   ;;  %v32_v2 = vld [vmem:[#allocation2] sm:$0xff]  ;;  %v33_v4 = vld [vmem:[#allocation2 + $0x8] sm:$0xff] }
  0x14   :  { %265 = vmatprep.mubr.bf16.mxu0 %v723_v0  ;;  %308 = vmatprep.mubr.bf16.mxu1 %v723_v0  ;;  %v36_v3 = vld [vmem:[#allocation2 + $0x20] sm:$0xff]  ;;  %v37_v6 = vld [vmem:[#allocation2 + $0x28] sm:$0xff]  ;;  %v34_v32 = vld [vmem:[#allocation2 + $0x10] sm:$0xff]  ;;  %vm229_vm0 = vcmask 523264   ;;  %v725_v63 = vmov 1  }
  0x15   :  { %667 = vset.pattern.permute.xlu0 %v723_v0  ;;  %668 = vset.pattern.permute.xlu1 %v724_v1  ;;  %v607_v5 = vcombine.high %v32_v2, %v36_v3  ;;  %v606_v7 = vcombine.low %v32_v2, %v36_v3  ;;  %v40_v8 = vld [vmem:[#allocation2 + $0x40] sm:$0xff]  ;;  %v609_v10 = vcombine.high %v33_v4, %v37_v6  ;;  %v41_v13 = vld [vmem:[#allocation2 + $0x48] sm:$0xff]  ;;  %v38_v33 = vld [vmem:[#allocation2 + $0x30] sm:$0xff] }
  0x16   :  { %v44_v9 = vld [vmem:[#allocation2 + $0x60] sm:$0xff]  ;;  %v608_v11 = vcombine.low %v33_v4, %v37_v6  ;;  %v45_v14 = vld [vmem:[#allocation2 + $0x68] sm:$0xff]  ;;  %v35_v34 = vld [vmem:[#allocation2 + $0x18] sm:$0xff]  ;;  %v611_v39 = vcombine.high %v34_v32, %v38_v33  ;;  %v610_v47 = vcombine.low %v34_v32, %v38_v33 }
  0x17   :  { %v615_v12 = vcombine.high %v40_v8, %v44_v9  ;;  %v48_v15 = vld [vmem:[#allocation2 + $0x80] sm:$0xff]  ;;  %233 = vmatprep.subr.bf16.mxu0 %v607_v5  ;;  %v617_v16 = vcombine.high %v41_v13, %v45_v14  ;;  %v49_v18 = vld [vmem:[#allocation2 + $0x88] sm:$0xff]  ;;  %276 = vmatprep.subr.bf16.mxu1 %v609_v10  ;;  %v614_v20 = vcombine.low %v40_v8, %v44_v9  ;;  %v39_v35 = vld [vmem:[#allocation2 + $0x38] sm:$0xff] }
  0x18   :  { %v52_v17 = vld [vmem:[#allocation2 + $0xa0] sm:$0xff]  ;;  %v53_v19 = vld [vmem:[#allocation2 + $0xa8] sm:$0xff]  ;;  %234 = vmatpush1.bf16.msra.mxu0 %v606_v7  ;;  %277 = vmatpush1.bf16.msra.mxu1 %v608_v11  ;;  %v616_v21 = vcombine.low %v41_v13, %v45_v14  ;;  %v613_v41 = vcombine.high %v35_v34, %v39_v35  ;;  %v42_v42 = vld [vmem:[#allocation2 + $0x50] sm:$0xff]  ;;  %v612_v48 = vcombine.low %v35_v34, %v39_v35 }
  0x19   :  { %235 = vmatprep.subr.bf16.mxu0 %v615_v12  ;;  %v623_v22 = vcombine.high %v48_v15, %v52_v17  ;;  %278 = vmatprep.subr.bf16.mxu1 %v617_v16  ;;  %v625_v23 = vcombine.high %v49_v18, %v53_v19  ;;  %v56_v24 = vld [vmem:[#allocation2 + $0xc0] sm:$0xff]  ;;  %v57_v26 = vld [vmem:[#allocation2 + $0xc8] sm:$0xff]  ;;  %v622_v28 = vcombine.low %v48_v15, %v52_v17  ;;  %v46_v43 = vld [vmem:[#allocation2 + $0x70] sm:$0xff] }
  0x1a   :  { %v60_v25 = vld [vmem:[#allocation2 + $0xe0] sm:$0xff]  ;;  %v61_v27 = vld [vmem:[#allocation2 + $0xe8] sm:$0xff]  ;;  %v624_v29 = vcombine.low %v49_v18, %v53_v19  ;;  %v43_v45 = vld [vmem:[#allocation2 + $0x58] sm:$0xff]  ;;  %v619_v49 = vcombine.high %v42_v42, %v46_v43  ;;  %v618_v55 = vcombine.low %v42_v42, %v46_v43 }
  0x1b   :  { %v631_v30 = vcombine.high %v56_v24, %v60_v25  ;;  %v633_v31 = vcombine.high %v57_v26, %v61_v27  ;;  %v437_v36 = vld [vmem:[%s938_s2] sm:$0xff]  ;;  %v630_v37 = vcombine.low %v56_v24, %v60_v25  ;;  %v632_v38 = vcombine.low %v57_v26, %v61_v27  ;;  %v438_v40 = vld [vmem:[%s938_s2 + $0x8] sm:$0xff]  ;;  %v47_v46 = vld [vmem:[#allocation2 + $0x78] sm:$0xff] }
  0x1c   :  { %236 = vmatpush1.bf16.msra.mxu0 %v614_v20  ;;  %279 = vmatpush1.bf16.msra.mxu1 %v616_v21  ;;  %v671_v44 = vld [vmem:[%s936_s0] sm:$0xff]   ;;  %v621_v50 = vcombine.high %v43_v45, %v47_v46  ;;  %v50_v51 = vld [vmem:[#allocation2 + $0x90] sm:$0xff]  ;;  %v51_v53 = vld [vmem:[#allocation2 + $0x98] sm:$0xff]  ;;  %v620_v56 = vcombine.low %v43_v45, %v47_v46  ;;  %s726_s0 = smov [#allocation5]  }
  0x1d   :  { %237 = vmatprep.subr.bf16.mxu0 %v623_v22  ;;  %280 = vmatprep.subr.bf16.mxu1 %v625_v23  ;;  %v54_v52 = vld [vmem:[#allocation2 + $0xb0] sm:$0xff]  ;;  %v55_v54 = vld [vmem:[#allocation2 + $0xb8] sm:$0xff]  ;;  %s593_s2 = sshll.u32 %s726_s0, 4  ;;  %s594_s2 = int_to_ptr.vmem [resolvable:$true] %s593_s2 }
  0x1e   :  { %509 = vperm.xlu0 %667, %v437_v36   ;;  %455 = vperm.xlu1 %668, %v437_v36   ;;  %v627_v57 = vcombine.high %v50_v51, %v54_v52  ;;  %v629_v58 = vcombine.high %v51_v53, %v55_v54  ;;  %v58_v59 = vld [vmem:[#allocation2 + $0xd0] sm:$0xff]  ;;  %v59_v61 = vld [vmem:[#allocation2 + $0xd8] sm:$0xff]  ;;  %v626_v1 = vcombine.low %v50_v51, %v54_v52  ;;  %s694_s4 = scalar_lea.vmem %s594_s2, 2048  ;;  %p699_p9 = scmp.lt.s32.totalorder %s594_s2, %s594_s2 }
  0x1f   :  { %v62_v60 = vld [vmem:[#allocation2 + $0xf0] sm:$0xff]  ;;  %v63_v62 = vld [vmem:[#allocation2 + $0xf8] sm:$0xff]  ;;  %v628_v2 = vcombine.low %v51_v53, %v55_v54  ;;  %p695_p8 = scmp.ne.s32.totalorder %s594_s2, %s694_s4  ;;  %p700_p10 = scmp.lt.s32.totalorder %s694_s4, %s694_s4 }
  0x20   :  { %238 = vmatpush1.bf16.msra.mxu0 %v622_v28  ;;  %281 = vmatpush1.bf16.msra.mxu1 %v624_v29  ;;  %v635_v3 = vcombine.high %v58_v59, %v62_v60  ;;  %v637_v4 = vcombine.high %v59_v61, %v63_v62  ;;  %v634_v5 = vcombine.low %v58_v59, %v62_v60 }
  0x21   :  { %239 = vmatprep.subr.bf16.mxu0 %v631_v30  ;;  %282 = vmatprep.subr.bf16.mxu1 %v633_v31  ;;  %v636_v6 = vcombine.low %v59_v61, %v63_v62  ;;  %p701_p11 = por %p700_p10, %p699_p9 }
  0x22   :  { %513 = vperm.xlu0 %667, %v438_v40   ;;  %458 = vperm.xlu1 %668, %v438_v40  }
  0x23   :  { %p702_p12 = pnand %p701_p11, %p695_p8 }
  0x24   :  { %240 = vmatpush1.bf16.msra.mxu0 %v630_v37  ;;  %283 = vmatpush1.bf16.msra.mxu1 %v632_v38 }
  0x25   :  { %319 = vmatprep.subr.bf16.mxu0 %v611_v39  ;;  %362 = vmatprep.subr.bf16.mxu1 %v613_v41 }
  0x26   :  { %669 = vset.pattern.permute.xlu0 %v725_v63  ;;  %670 = vset.pattern.permute.xlu1 %v725_v63 }
  0x27   :  { %638 = vmatmul.mubr.msk.bf16.vlgmr.msra.gmra.mrb[0].mxu0 %vm229_vm0, %v671_v44  ;;  %639 = vmatmul.mubr.msk.bf16.vlgmr.msra.gmra.mrb[0].mxu1 %vm229_vm0, %v671_v44 }
  0x28   :  { %320 = vmatpush1.bf16.msra.mxu0 %v610_v47  ;;  %363 = vmatpush1.bf16.msra.mxu1 %v612_v48 }
  0x29   :  { %321 = vmatprep.subr.bf16.mxu0 %v619_v49  ;;  %364 = vmatprep.subr.bf16.mxu1 %v621_v50 }
  0x2a   :  { %351 = vmatprep.mubr.bf16.mxu0 %v723_v0  ;;  %394 = vmatprep.mubr.bf16.mxu1 %v723_v0  ;;  %v445_v0 = vlaneseq }
  0x2b   :  { %549 = vperm.xlu0 %669, %v437_v36   ;;  %553 = vperm.xlu1 %670, %v438_v40  }
  0x2c   :  { %322 = vmatpush1.bf16.msra.mxu0 %v618_v55  ;;  %365 = vmatpush1.bf16.msra.mxu1 %v620_v56  ;;  %v781_v8 = vand.u32 127, %v445_v0 }
  0x2d   :  { %323 = vmatprep.subr.bf16.mxu0 %v627_v57  ;;  %366 = vmatprep.subr.bf16.mxu1 %v629_v58 }
  0x2e   :  { %v786_v10 = vadd.s32 128, %v781_v8  ;;  %v789_v11 = vadd.s32 256, %v781_v8  ;;  %v792_v12 = vadd.s32 384, %v781_v8  ;;  %v799_v16 = vadd.s32 512, %v781_v8 }
  0x2f   :  { %v802_v17 = vadd.s32 768, %v781_v8  ;;  %v805_v18 = vadd.s32 640, %v781_v8 }
  0x30   :  { %324 = vmatpush1.bf16.msra.mxu0 %v626_v1  ;;  %367 = vmatpush1.bf16.msra.mxu1 %v628_v2 }
  0x31   :  { %325 = vmatprep.subr.bf16.mxu0 %v635_v3  ;;  %368 = vmatprep.subr.bf16.mxu1 %v637_v4  ;;  %v866_v3 = vadd.s32 896, %v781_v8 }
  0x34   :  { %326 = vmatpush1.bf16.msra.mxu0 %v634_v5  ;;  %369 = vmatpush1.bf16.msra.mxu1 %v636_v6 }
  0x37   :  { %640 = vmatmul.mubr.msk.bf16.vlgmr.msra.gmra.mrb[4].mxu0 %vm229_vm0, %v671_v44  ;;  %641 = vmatmul.mubr.msk.bf16.vlgmr.msra.gmra.mrb[4].mxu1 %vm229_vm0, %v671_v44 }
  0x9d   :  { %v779_v7 = vpop.permute.xlu0 %509  ;;  %v783_v9 = vpop.permute.xlu1 %455 }
  0x9e   :  { %vm460_vm1 = vcmp.eq.s32.totalorder %v781_v8, %v783_v9  ;;  %vm461_vm2 = vcmp.eq.s32.totalorder %v786_v10, %v783_v9  ;;  %vm462_vm3 = vcmp.eq.s32.totalorder %v789_v11, %v783_v9  ;;  %vm463_vm4 = vcmp.eq.s32.totalorder %v792_v12, %v783_v9 }
  0xa1   :  { %v794_v13 = vpop.permute.xlu0 %513  ;;  %v796_v15 = vpop.permute.xlu1 %458 }
  0xa2   :  { %vm468_vm5 = vcmp.eq.s32.totalorder %v781_v8, %v796_v15  ;;  %vm469_vm6 = vcmp.eq.s32.totalorder %v786_v10, %v796_v15  ;;  %vm470_vm8 = vcmp.eq.s32.totalorder %v789_v11, %v796_v15  ;;  %vm471_vm15 = vcmp.eq.s32.totalorder %v792_v12, %v796_v15 }
  0xaa   :  { %v825_v43 = vpop.permute.xlu0 %549  ;;  %v840_v55 = vpop.permute.xlu1 %553 }
  0xfa   :  { %v267_v14 = vpop.f32.mrb[0].mxu0  ;;  %v310_v20 = vpop.f32.mrb[0].mxu1 }
  0xfb   :  { %v642_v19 = vclamps-f32 %v267_v14, 32.0  ;;  %v269_v21 = vpop.f32.mrb[1].mxu0  ;;  %v644_v22 = vclamps-f32 %v310_v20, 32.0  ;;  %v312_v24 = vpop.f32.mrb[1].mxu1 }
  0xfc   :  { %v643_v23 = vclamps-f32 %v269_v21, 32.0  ;;  %v271_v25 = vpop.f32.mrb[2].mxu0  ;;  %v645_v27 = vclamps-f32 %v312_v24, 32.0  ;;  %v314_v29 = vpop.f32.mrb[2].mxu1 }
  0xfd   :  { %v476_v26 = vmul.f32 1.2, %v642_v19  ;;  %v650_v28 = vclamps-f32 %v271_v25, 32.0  ;;  %v273_v30 = vpop.f32.mrb[3].mxu0  ;;  %vm516_vm7 = vcmp.gt.f32.partialorder %v642_v19, %v779_v7  ;;  %v478_v31 = vmul.f32 1.2, %v644_v22 }
  0xfe   :  { %v477_v32 = vmul.f32 1.2, %v643_v23  ;;  %v316_v33 = vpop.f32.mrb[3].mxu1  ;;  %vm518_vm9 = vcmp.gt.f32.partialorder %v644_v22, %v779_v7  ;;  %v479_v35 = vmul.f32 1.2, %v645_v27  ;;  %vm517_vm10 = vcmp.gt.f32.partialorder %v643_v23, %v779_v7 }
  0xff   :  { %v492_v34 = vadd.f32 6.4, %v476_v26  ;;  %v484_v36 = vmul.f32 1.2, %v650_v28  ;;  %v494_v37 = vadd.f32 6.4, %v478_v31  ;;  %vm519_vm11 = vcmp.gt.f32.partialorder %v645_v27, %v779_v7 }
 0x100   :  { %v493_v38 = vadd.f32 6.4, %v477_v32  ;;  %v652_v39 = vclamps-f32 %v314_v29, 32.0  ;;  %v495_v41 = vadd.f32 6.4, %v479_v35  ;;  %v651_v42 = vclamps-f32 %v273_v30, 32.0 }
 0x101   :  { %v532_v40 = vsel %vm516_vm7, %v492_v34, %v642_v19  ;;  %v534_v44 = vsel %vm518_vm9, %v494_v37, %v644_v22  ;;  %v500_v46 = vadd.f32 6.4, %v484_v36  ;;  %vm524_vm12 = vcmp.gt.f32.partialorder %v650_v28, %v794_v13 }
 0x102   :  { %v533_v45 = vsel %vm517_vm10, %v493_v38, %v643_v23  ;;  %v486_v47 = vmul.f32 1.2, %v652_v39  ;;  %v535_v48 = vsel %vm519_vm11, %v495_v41, %v645_v27  ;;  %v485_v49 = vmul.f32 1.2, %v651_v42 }
 0x103   :  { %v653_v50 = vclamps-f32 %v316_v33, 32.0  ;;  %v556_v52 = vsel %vm460_vm1, %v825_v43, %v532_v40  ;;  %v557_v53 = vsel %vm461_vm2, %v825_v43, %v533_v45  ;;  %v558_v54 = vsel %vm462_vm3, %v825_v43, %v534_v44 }
 0x104   :  { %v502_v51 = vadd.f32 6.4, %v486_v47  ;;  %vm526_vm13 = vcmp.gt.f32.partialorder %v652_v39, %v794_v13  ;;  %v501_v56 = vadd.f32 6.4, %v485_v49  ;;  %v559_v58 = vsel %vm463_vm4, %v825_v43, %v535_v48  ;;  %572 = vst [vmem:[#allocation5] sm:$0xff] %v556_v52  ;;  %573 = vst [vmem:[#allocation5 + $0x8] sm:$0xff] %v557_v53 }
 0x105   :  { %v487_v57 = vmul.f32 1.2, %v653_v50  ;;  %574 = vst [vmem:[#allocation5 + $0x10] sm:$0xff] %v558_v54  ;;  %vm525_vm14 = vcmp.gt.f32.partialorder %v651_v42, %v794_v13  ;;  %575 = vst [vmem:[#allocation5 + $0x18] sm:$0xff] %v559_v58  ;;  %v540_v59 = vsel %vm524_vm12, %v500_v46, %v650_v28  ;;  %vm527_vm0 = vcmp.gt.f32.partialorder %v653_v50, %v794_v13 }
 0x106   :  { %v542_v60 = vsel %vm526_vm13, %v502_v51, %v652_v39  ;;  %v541_v61 = vsel %vm525_vm14, %v501_v56, %v651_v42  ;;  %v564_v63 = vsel %vm468_vm5, %v840_v55, %v540_v59  ;;  %vm464_vm1 = vcmp.eq.s32.totalorder %v799_v16, %v783_v9 }
 0x107   :  { %v503_v62 = vadd.f32 6.4, %v487_v57  ;;  %v566_v1 = vsel %vm470_vm8, %v840_v55, %v542_v60  ;;  %v565_v2 = vsel %vm469_vm6, %v840_v55, %v541_v61  ;;  %580 = vst [vmem:[#allocation5 + $0x40] sm:$0xff] %v564_v63  ;;  %vm466_vm2 = vcmp.eq.s32.totalorder %v802_v17, %v783_v9 }
 0x108   :  { %582 = vst [vmem:[#allocation5 + $0x50] sm:$0xff] %v566_v1  ;;  %581 = vst [vmem:[#allocation5 + $0x48] sm:$0xff] %v565_v2  ;;  %vm465_vm3 = vcmp.eq.s32.totalorder %v805_v18, %v783_v9  ;;  %vm467_vm4 = vcmp.eq.s32.totalorder %v866_v3, %v783_v9  ;;  %vm472_vm5 = vcmp.eq.s32.totalorder %v799_v16, %v796_v15 }
 0x109   :  { %v543_v4 = vsel %vm527_vm0, %v503_v62, %v653_v50  ;;  %vm474_vm12 = vcmp.eq.s32.totalorder %v802_v17, %v796_v15  ;;  %vm473_vm14 = vcmp.eq.s32.totalorder %v805_v18, %v796_v15  ;;  %vm475_vm0 = vcmp.eq.s32.totalorder %v866_v3, %v796_v15 }
 0x10a   :  { %v567_v5 = vsel %vm471_vm15, %v840_v55, %v543_v4  ;;  %v353_v6 = vpop.f32.mrb[4].mxu0  ;;  %v396_v11 = vpop.f32.mrb[4].mxu1 }
 0x10b   :  { %583 = vst [vmem:[#allocation5 + $0x58] sm:$0xff] %v567_v5  ;;  %v646_v0 = vclamps-f32 %v353_v6, 32.0  ;;  %v355_v10 = vpop.f32.mrb[5].mxu0  ;;  %v648_v8 = vclamps-f32 %v396_v11, 32.0  ;;  %v398_v14 = vpop.f32.mrb[5].mxu1 }
 0x10c   :  { %v647_v12 = vclamps-f32 %v355_v10, 32.0  ;;  %v357_v19 = vpop.f32.mrb[6].mxu0  ;;  %v649_v21 = vclamps-f32 %v398_v14, 32.0  ;;  %v400_v23 = vpop.f32.mrb[6].mxu1 }
 0x10d   :  { %v480_v20 = vmul.f32 1.2, %v646_v0  ;;  %vm520_vm6 = vcmp.gt.f32.partialorder %v646_v0, %v779_v7  ;;  %v654_v22 = vclamps-f32 %v357_v19, 32.0  ;;  %v359_v24 = vpop.f32.mrb[7].mxu0  ;;  %v482_v25 = vmul.f32 1.2, %v648_v8 }
 0x10e   :  { %vm522_vm7 = vcmp.gt.f32.partialorder %v648_v8, %v779_v7  ;;  %v481_v26 = vmul.f32 1.2, %v647_v12  ;;  %vm521_vm8 = vcmp.gt.f32.partialorder %v647_v12, %v779_v7  ;;  %v402_v27 = vpop.f32.mrb[7].mxu1  ;;  %v483_v29 = vmul.f32 1.2, %v649_v21 }
 0x10f   :  { %v496_v28 = vadd.f32 6.4, %v480_v20  ;;  %vm523_vm9 = vcmp.gt.f32.partialorder %v649_v21, %v779_v7  ;;  %v488_v30 = vmul.f32 1.2, %v654_v22  ;;  %v498_v31 = vadd.f32 6.4, %v482_v25 }
 0x110   :  { %v497_v32 = vadd.f32 6.4, %v481_v26  ;;  %vm528_vm10 = vcmp.gt.f32.partialorder %v654_v22, %v794_v13  ;;  %v656_v33 = vclamps-f32 %v400_v23, 32.0  ;;  %v499_v35 = vadd.f32 6.4, %v483_v29 }
 0x111   :  { %v536_v34 = vsel %vm520_vm6, %v496_v28, %v646_v0  ;;  %v504_v36 = vadd.f32 6.4, %v488_v30  ;;  %v655_v37 = vclamps-f32 %v359_v24, 32.0  ;;  %v538_v39 = vsel %vm522_vm7, %v498_v31, %v648_v8 }
 0x112   :  { %v560_v38 = vsel %vm464_vm1, %v825_v43, %v536_v34  ;;  %v537_v40 = vsel %vm521_vm8, %v497_v32, %v647_v12  ;;  %v490_v41 = vmul.f32 1.2, %v656_v33  ;;  %v562_v42 = vsel %vm466_vm2, %v825_v43, %v538_v39 }
 0x113   :  { %576 = vst [vmem:[#allocation5 + $0x20] sm:$0xff] %v560_v38  ;;  %v561_v44 = vsel %vm465_vm3, %v825_v43, %v537_v40  ;;  %v539_v45 = vsel %vm523_vm9, %v499_v35, %v649_v21  ;;  %v544_v46 = vsel %vm528_vm10, %v504_v36, %v654_v22  ;;  %578 = vst [vmem:[#allocation5 + $0x30] sm:$0xff] %v562_v42  ;;  %v489_v7 = vmul.f32 1.2, %v655_v37 }
 0x114   :  { %577 = vst [vmem:[#allocation5 + $0x28] sm:$0xff] %v561_v44  ;;  %v563_v47 = vsel %vm467_vm4, %v825_v43, %v539_v45  ;;  %v568_v48 = vsel %vm472_vm5, %v840_v55, %v544_v46  ;;  %v506_v49 = vadd.f32 6.4, %v490_v41  ;;  %vm530_vm11 = vcmp.gt.f32.partialorder %v656_v33, %v794_v13 }
 0x115   :  { %579 = vst [vmem:[#allocation5 + $0x38] sm:$0xff] %v563_v47  ;;  %584 = vst [vmem:[#allocation5 + $0x60] sm:$0xff] %v568_v48  ;;  %v657_v50 = vclamps-f32 %v402_v27, 32.0  ;;  %v505_v9 = vadd.f32 6.4, %v489_v7  ;;  %vm529_vm13 = vcmp.gt.f32.partialorder %v655_v37, %v794_v13 }
 0x116   :  { %v546_v51 = vsel %vm530_vm11, %v506_v49, %v656_v33 }
 0x117   :  { %v570_v52 = vsel %vm474_vm12, %v840_v55, %v546_v51  ;;  %v491_v43 = vmul.f32 1.2, %v657_v50  ;;  %v545_v16 = vsel %vm529_vm13, %v505_v9, %v655_v37  ;;  %vm531_vm15 = vcmp.gt.f32.partialorder %v657_v50, %v794_v13 }
 0x118   :  { %586 = vst [vmem:[#allocation5 + $0x70] sm:$0xff] %v570_v52  ;;  %v569_v54 = vsel %vm473_vm14, %v840_v55, %v545_v16 }
 0x119   :  { %v507_v53 = vadd.f32 6.4, %v491_v43  ;;  %585 = vst [vmem:[#allocation5 + $0x68] sm:$0xff] %v569_v54 }
 0x11b   :  { %v547_v17 = vsel %vm531_vm15, %v507_v53, %v657_v50 }
 0x11c   :  { %v571_v56 = vsel %vm475_vm0, %v840_v55, %v547_v17 }
 0x11d   :  { %587 = vst [vmem:[#allocation5 + $0x78] sm:$0xff] %v571_v56 }
 0x11e   :  { %705 = shalt.err (!%p702_p12)
}
 0x11f   :  { %s706_s7 = scalar_lea.hbm %s939_s3, 2048 }
 0x120   :  { %p707_p13 = scmp.ne.s32.totalorder %s939_s3, %s706_s7  ;;  %p710_p0 = scmp.lt.u32.totalorder %s706_s7, %s939_s3 }
 0x122   :  { %p712_p1 = pnand %p710_p0, %p707_p13 }
 0x124   :  { %715 = shalt.err (!%p712_p1)
}
 0x125   :  { %s727_s12 = smov 1024   ;;  %s728_s13 = smov 64  }
 0x126   :  { %599 = dma.vmem_to_hbm [thread:$0]  %s594_s2, 2048, %s939_s3, [#allocation4], %s727_s12, %s727_s12, %s728_s13  }
 0x127   :  { %718 = dma.done.wait [#allocation4], 2048  }
 0x128   :  { %719 = vsyncadd [#allocation4], 4294965248 }
 0x129   :  { %603 = vsyncpa [#allocation3], 1 }
 0x12a   :  { %604 = vsyncpa [#allocation4], 1 }

</bundles_post_ra>
